<compile_context>
chip_gen: v7x
topology: tpu7x:2x2x1
jax: 0.10.0
libtpu: 0.0.40
codegen_flags: <defaults>
</compile_context>

<pallas_src>
import math

import jax
import jax.numpy as jnp
from jax.experimental import pallas as pl
from jax.experimental.pallas import tpu as pltpu


def _make_mlp_kernel(num_layers):
    """Fused MLP kernel. refs = (x, w0, b0, ..., w_{L-1}, b_{L-1}, out)."""

    def kernel(*refs):
        x_ref = refs[0]
        o_ref = refs[-1]
        # (1, C, tile_hw) block -> (C, tile_hw) feature-major activation.
        h = x_ref[0].astype(jnp.float32)
        for i in range(num_layers):
            w_ref = refs[1 + 2 * i]          # (out_i, in_i)  PyTorch layout
            b_ref = refs[2 + 2 * i]          # (out_i, 1)
            h = (
                jnp.dot(w_ref[...], h, preferred_element_type=jnp.float32)
                + b_ref[...]
            )
            if i < num_layers - 1:
                h = jnp.maximum(h, 0.0)      # ReLU on all but the last layer
        o_ref[0] = h.astype(o_ref.dtype)

    return kernel


def _pick_tile_hw(hw, target=512):
    """Token tile: full extent if small/unaligned, else the largest multiple
    of 128 <= target that divides HW (so blocks are lane-dense and exact)."""
    if hw <= target or hw % 128 != 0:
        return hw
    best = 128
    t = 256
    while t <= target:
        if hw % t == 0:
            best = t
        t += 128
    return best


def init_mlp_params(key, input_dim, hidden_dim, output_dim, num_layers,
                    dtype=jnp.float32):
    """nn.Linear-style init. Weight (out, in), bias (out, 1) — PyTorch layout."""
    h = [hidden_dim] * (num_layers - 1)
    in_dims = [input_dim] + h
    out_dims = h + [output_dim]
    params = []
    for n_in, n_out in zip(in_dims, out_dims):
        key, kw, kb = jax.random.split(key, 3)
        bound = 1.0 / math.sqrt(n_in)
        w = jax.random.uniform(kw, (n_out, n_in), dtype, -bound, bound)
        b = jax.random.uniform(kb, (n_out, 1), dtype, -bound, bound)
        params.append((w, b))
    return params


def mlp_forward(x, params, output_dim, *, tile_hw=512):
    """Forward pass of the MLP. x: (B, C, H, W) -> (B, output_dim, H, W)."""
    B, C, H, W = x.shape
    HW = H * W
    num_layers = len(params)

    t_hw = _pick_tile_hw(HW, tile_hw)
    grid = (B, HW // t_hw)

    x3 = x.reshape(B, C, HW)                 # free reshape, no data movement

    flat_params = []
    for w_i, b_i in params:
        flat_params.extend([w_i, b_i])

    in_specs = [pl.BlockSpec((1, C, t_hw), lambda bi, ti: (bi, 0, ti))]
    for w_i, b_i in params:
        in_specs.append(pl.BlockSpec(w_i.shape, lambda bi, ti: (0, 0)))
        in_specs.append(pl.BlockSpec(b_i.shape, lambda bi, ti: (0, 0)))

    out_spec = pl.BlockSpec((1, output_dim, t_hw), lambda bi, ti: (bi, 0, ti))

    # VMEM budget: double-buffered I/O blocks + resident params + f32 work set.
    itemsize = jnp.dtype(x.dtype).itemsize
    max_feat = max([C] + [w_i.shape[0] for w_i, _ in params])
    block_bytes = 2 * (C + output_dim) * t_hw * itemsize
    param_bytes = 2 * sum(w_i.size + b_i.size for w_i, b_i in params) * itemsize
    work_bytes = 4 * max_feat * t_hw * 4
    vmem_limit = int(min(64 * 2**20,
                         max(32 * 2**20,
                             block_bytes + param_bytes + work_bytes + (4 << 20))))

    flops = 2 * B * HW * sum(w_i.shape[0] * w_i.shape[1] for w_i, _ in params)
    bytes_accessed = (
        B * HW * (C + output_dim) * itemsize
        + sum(w_i.size + b_i.size for w_i, b_i in params) * itemsize
    )
    cost = pl.CostEstimate(flops=flops, transcendentals=0,
                           bytes_accessed=bytes_accessed)

    out = pl.pallas_call(
        _make_mlp_kernel(num_layers),
        out_shape=jax.ShapeDtypeStruct((B, output_dim, HW), x.dtype),
        grid_spec=pltpu.PrefetchScalarGridSpec(
            num_scalar_prefetch=0,
            grid=grid,
            in_specs=in_specs,
            out_specs=out_spec,
        ),
        compiler_params=pltpu.CompilerParams(
            dimension_semantics=("parallel", "parallel"),
            vmem_limit_bytes=vmem_limit,
        ),
        cost_estimate=cost,
    )(x3, *flat_params)

    return out.reshape(B, output_dim, H, W)   # free reshape


def mlp_reference(x, params, output_dim):
    """Pure-JAX reference mirroring the PyTorch forward."""
    B, C, H, W = x.shape
    num_layers = len(params)
    h = jnp.transpose(x.reshape(B, C, H * W), (0, 2, 1))   # (B, HW, C)
    for i, (w, b) in enumerate(params):
        h = h @ w.T + b[:, 0]
        if i < num_layers - 1:
            h = jax.nn.relu(h)
    return jnp.transpose(h, (0, 2, 1)).reshape(B, output_dim, H, W)


if __name__ == "__main__":
    # Small shapes consistent with the module's forward.
    B, C, H, W = 2, 4, 16, 16        # input_dim = C = 4
    hidden_dim = 32
    output_dim = 4
    num_layers = 3

    key = jax.random.PRNGKey(0)
    key, kx = jax.random.split(key)
    x = jax.random.normal(kx, (B, C, H, W), jnp.float32)

    params = init_mlp_params(key, C, hidden_dim, output_dim, num_layers)

    out = jax.block_until_ready(mlp_forward(x, params, output_dim))
    ref = mlp_reference(x, params, output_dim)

    assert out.shape == (B, output_dim, H, W)
    assert jnp.allclose(out, ref, atol=1e-5, rtol=1e-5), "mismatch vs reference"

    print("KERNEL_OK")
</pallas_src>

<mosaic_0001>
module attributes {stable_mosaic.version = 11 : i64} {
  func.func @kernel(%arg0: i32, %arg1: i32, %arg2: memref<1x4x256xf32, #tpu.memory_space<vmem>>, %arg3: memref<32x4xf32, #tpu.memory_space<vmem>>, %arg4: memref<32x1xf32, #tpu.memory_space<vmem>>, %arg5: memref<32x32xf32, #tpu.memory_space<vmem>>, %arg6: memref<32x1xf32, #tpu.memory_space<vmem>>, %arg7: memref<4x32xf32, #tpu.memory_space<vmem>>, %arg8: memref<4x1xf32, #tpu.memory_space<vmem>>, %arg9: memref<1x4x256xf32, #tpu.memory_space<vmem>>) attributes {dimension_semantics = [#tpu.dimension_semantics<parallel>, #tpu.dimension_semantics<parallel>], iteration_bounds = array<i64: 2, 1>, scalar_prefetch = 0 : i64, scratch_operands = 0 : i64, tpu.core_type = #tpu.core_type<tc>, window_params = [{transform_indices = @transform_0, window_bounds = array<i64: 1, 4, 256>}, {pipeline_mode = #tpu.pipeline_mode<synchronous>, transform_indices = @transform_1, window_bounds = array<i64: 32, 4>}, {pipeline_mode = #tpu.pipeline_mode<synchronous>, transform_indices = @transform_2, window_bounds = array<i64: 32, 1>}, {pipeline_mode = #tpu.pipeline_mode<synchronous>, transform_indices = @transform_3, window_bounds = array<i64: 32, 32>}, {pipeline_mode = #tpu.pipeline_mode<synchronous>, transform_indices = @transform_4, window_bounds = array<i64: 32, 1>}, {pipeline_mode = #tpu.pipeline_mode<synchronous>, transform_indices = @transform_5, window_bounds = array<i64: 4, 32>}, {pipeline_mode = #tpu.pipeline_mode<synchronous>, transform_indices = @transform_6, window_bounds = array<i64: 4, 1>}, {transform_indices = @transform_7, window_bounds = array<i64: 1, 4, 256>}]} {
    %c0 = arith.constant 0 : index
    %c0_0 = arith.constant 0 : index
    %c0_1 = arith.constant 0 : index
    %0 = vector.load %arg2[%c0, %c0_0, %c0_1] : memref<1x4x256xf32, #tpu.memory_space<vmem>>, vector<1x4x256xf32>
    %1 = vector.shape_cast %0 : vector<1x4x256xf32> to vector<4x256xf32>
    %c0_2 = arith.constant 0 : index
    %c0_3 = arith.constant 0 : index
    %2 = vector.load %arg3[%c0_2, %c0_3] : memref<32x4xf32, #tpu.memory_space<vmem>>, vector<32x4xf32>
    %cst = arith.constant dense<0.000000e+00> : vector<32x256xf32>
    %3 = tpu.matmul %2, %1, %cst {dimension_numbers = #tpu.dot_dimension_numbers<[1], [0], [0], [1], [0, 0, 1, 1], [], []>} : vector<32x4xf32>, vector<4x256xf32>, vector<32x256xf32> -> vector<32x256xf32>
    %c0_4 = arith.constant 0 : index
    %c0_5 = arith.constant 0 : index
    %4 = vector.load %arg4[%c0_4, %c0_5] : memref<32x1xf32, #tpu.memory_space<vmem>>, vector<32x1xf32>
    %5 = vector.broadcast %4 : vector<32x1xf32> to vector<32x256xf32>
    %6 = arith.addf %3, %5 : vector<32x256xf32>
    %cst_6 = arith.constant 0.000000e+00 : f32
    %7 = vector.broadcast %cst_6 : f32 to vector<32x256xf32>
    %8 = arith.maximumf %6, %7 : vector<32x256xf32>
    %c0_7 = arith.constant 0 : index
    %c0_8 = arith.constant 0 : index
    %9 = vector.load %arg5[%c0_7, %c0_8] : memref<32x32xf32, #tpu.memory_space<vmem>>, vector<32x32xf32>
    %cst_9 = arith.constant dense<0.000000e+00> : vector<32x256xf32>
    %10 = tpu.matmul %9, %8, %cst_9 {dimension_numbers = #tpu.dot_dimension_numbers<[1], [0], [0], [1], [0, 0, 1, 1], [], []>} : vector<32x32xf32>, vector<32x256xf32>, vector<32x256xf32> -> vector<32x256xf32>
    %c0_10 = arith.constant 0 : index
    %c0_11 = arith.constant 0 : index
    %11 = vector.load %arg6[%c0_10, %c0_11] : memref<32x1xf32, #tpu.memory_space<vmem>>, vector<32x1xf32>
    %12 = vector.broadcast %11 : vector<32x1xf32> to vector<32x256xf32>
    %13 = arith.addf %10, %12 : vector<32x256xf32>
    %cst_12 = arith.constant 0.000000e+00 : f32
    %14 = vector.broadcast %cst_12 : f32 to vector<32x256xf32>
    %15 = arith.maximumf %13, %14 : vector<32x256xf32>
    %c0_13 = arith.constant 0 : index
    %c0_14 = arith.constant 0 : index
    %16 = vector.load %arg7[%c0_13, %c0_14] : memref<4x32xf32, #tpu.memory_space<vmem>>, vector<4x32xf32>
    %cst_15 = arith.constant dense<0.000000e+00> : vector<4x256xf32>
    %17 = tpu.matmul %16, %15, %cst_15 {dimension_numbers = #tpu.dot_dimension_numbers<[1], [0], [0], [1], [0, 0, 1, 1], [], []>} : vector<4x32xf32>, vector<32x256xf32>, vector<4x256xf32> -> vector<4x256xf32>
    %c0_16 = arith.constant 0 : index
    %c0_17 = arith.constant 0 : index
    %18 = vector.load %arg8[%c0_16, %c0_17] : memref<4x1xf32, #tpu.memory_space<vmem>>, vector<4x1xf32>
    %19 = vector.broadcast %18 : vector<4x1xf32> to vector<4x256xf32>
    %20 = arith.addf %17, %19 : vector<4x256xf32>
    %c0_18 = arith.constant 0 : index
    %c0_19 = arith.constant 0 : index
    %c0_20 = arith.constant 0 : index
    %21 = vector.load %arg9[%c0_18, %c0_19, %c0_20] : memref<1x4x256xf32, #tpu.memory_space<vmem>>, vector<1x4x256xf32>
    %22 = vector.shape_cast %21 : vector<1x4x256xf32> to vector<4x256xf32>
    %23 = vector.shape_cast %20 : vector<4x256xf32> to vector<1x4x256xf32>
    tpu.vector_store %arg9[%c0_18, %c0_19, %c0_20], %23 {strides = array<i32>} : memref<1x4x256xf32, #tpu.memory_space<vmem>>, vector<1x4x256xf32>,
    return
  }
  func.func @transform_0(%arg0: i32, %arg1: i32) -> (i32, i32, i32) {
    %c0_i32 = arith.constant 0 : i32
    %c0_i32_0 = arith.constant 0 : i32
    return %arg0, %c0_i32, %arg1 : i32, i32, i32
  }
  func.func @transform_1(%arg0: i32, %arg1: i32) -> (i32, i32) {
    %c0_i32 = arith.constant 0 : i32
    %c0_i32_0 = arith.constant 0 : i32
    %c0_i32_1 = arith.constant 0 : i32
    return %c0_i32, %c0_i32_0 : i32, i32
  }
  func.func @transform_2(%arg0: i32, %arg1: i32) -> (i32, i32) {
    %c0_i32 = arith.constant 0 : i32
    %c0_i32_0 = arith.constant 0 : i32
    %c0_i32_1 = arith.constant 0 : i32
    return %c0_i32, %c0_i32_0 : i32, i32
  }
  func.func @transform_3(%arg0: i32, %arg1: i32) -> (i32, i32) {
    %c0_i32 = arith.constant 0 : i32
    %c0_i32_0 = arith.constant 0 : i32
    %c0_i32_1 = arith.constant 0 : i32
    return %c0_i32, %c0_i32_0 : i32, i32
  }
  func.func @transform_4(%arg0: i32, %arg1: i32) -> (i32, i32) {
    %c0_i32 = arith.constant 0 : i32
    %c0_i32_0 = arith.constant 0 : i32
    %c0_i32_1 = arith.constant 0 : i32
    return %c0_i32, %c0_i32_0 : i32, i32
  }
  func.func @transform_5(%arg0: i32, %arg1: i32) -> (i32, i32) {
    %c0_i32 = arith.constant 0 : i32
    %c0_i32_0 = arith.constant 0 : i32
    %c0_i32_1 = arith.constant 0 : i32
    return %c0_i32, %c0_i32_0 : i32, i32
  }
  func.func @transform_6(%arg0: i32, %arg1: i32) -> (i32, i32) {
    %c0_i32 = arith.constant 0 : i32
    %c0_i32_0 = arith.constant 0 : i32
    %c0_i32_1 = arith.constant 0 : i32
    return %c0_i32, %c0_i32_0 : i32, i32
  }
  func.func @transform_7(%arg0: i32, %arg1: i32) -> (i32, i32, i32) {
    %c0_i32 = arith.constant 0 : i32
    %c0_i32_0 = arith.constant 0 : i32
    return %arg0, %c0_i32, %arg1 : i32, i32, i32
  }
}

</mosaic_0001>

<bundles_post_ra>
// kernel: tpu_custom_call.1
= control target key start
LH: loop header
LB: loop body
LE: loop exit
PB: predicated region body
PF: predicated region fallthrough
CT: control target
= control target key end

     0   :  { %12 = vsyncpa [#allocation3], 0  ;;  %s1180_s0 = inlined_call_operand.vmem [shape: f32[2,4,256], index: 0, kind: input, shape index: {}]   ;;  %s1181_s1 = inlined_call_operand.vmem [shape: f32[32,4], index: 1, kind: input, shape index: {}]   ;;  %s1182_s2 = inlined_call_operand.vmem [shape: f32[32,1], index: 2, kind: input, shape index: {}]   ;;  %s1183_s3 = inlined_call_operand.vmem [shape: f32[32,32], index: 3, kind: input, shape index: {}]   ;;  %s1184_s4 = inlined_call_operand.vmem [shape: f32[32,1], index: 4, kind: input, shape index: {}]   ;;  %s1185_s5 = inlined_call_operand.vmem [shape: f32[4,32], index: 5, kind: input, shape index: {}]   ;;  %s1186_s6 = inlined_call_operand.vmem [shape: f32[4,1], index: 6, kind: input, shape index: {}]   ;;  %s1187_s7 = inlined_call_operand.hbm [shape: f32[2,4,256], index: 7, kind: output, shape index: {}]  }
   0x1   :  { %14 = vsyncpa [#allocation3 + $0x1], 0  ;;  %s996_s24 = smov 0   ;;  %s998_s25 = smov 0  }
   0x2   :  { %s1000_s26 = smov 0   ;;  %s1002_s27 = smov 0  }
   0x3   :  { %s1004_s28 = smov 0   ;;  %s1006_s29 = smov 0  }
   0x4 LB: > { %s771_s30 = sadd.s32 4294967295, %s951_s29   ;;  %s772_s8 = sadd.s32 4294967294, %s951_s29   ;;  %s951_s29 = sphi %s1006_s29, %s20_s29   ;;  %s947_s28 = sphi %s1004_s28, %s1194_s28   ;;  %s943_s27 = sphi %s1002_s27, %s1193_s27   ;;  %s939_s26 = sphi %s1000_s26, %s1192_s26   ;;  %s935_s25 = sphi %s998_s25, %s1191_s25   ;;  %s931_s24 = sphi %s996_s24, %s1190_s24  }
   0x5   : > { %s32_s9 = sadd.s32 1, %s947_s28  ;;  %s195_s10 = sadd.s32 1, %s939_s26 }
   0x6   : > { %p34_p0 = scmp.ge.s32.totalorder %s32_s9, 2  ;;  %p205_p1 = scmp.ne.s32.totalorder %s939_s26, %s935_s25 }
   0x7   : > { %p206_p2 = scmp.eq.s32.totalorder %s771_s30, 1  ;;  %p211_p3 = scmp.ne.s32.totalorder %s935_s25, %s931_s24 }
   0x8   : > { %s1196_s9 = smov (%p34_p0, %s32_s9), 0  ;;  %p212_p5 = scmp.eq.s32.totalorder %s772_s8, 1 }
   0x9   : > { %p1036_p4 = por %p206_p2, %p205_p1  ;;  %s190_s12 = ssub.s32 %s947_s28, %s1196_s9 }
   0xa   : > { %p775_p6 = scmp.ge.s32.totalorder %s951_s29, 1  ;;  %p193_p7 = scmp.eq.s32.totalorder %s190_s12, 0 }
   0xb   : > { %p1043_p8 = por %p212_p5, %p211_p3  ;;  %p261_p9 = scmp.lt.s32.totalorder %s951_s29, 3 }
   0xc   : > { %s1049_s14 = scalar_select %p193_p7, %s939_s26, %s195_s10  }
   0xd   : > { %p262_p10 = pnand %p775_p6, %p261_p9 }
   0xe   : > { %p298_p11 = scmp.lt.s32.totalorder (!%p262_p10), %s943_s27, 1  ;;  %v953_v0 = vmov (!%p262_p10), 0.0   ;;  %v313_v1 = vld [vmem:[%s1182_s2] sm:$0xff] (!%p262_p10)  ;;  %v954_v2 = vmov (!%p262_p10), 0   ;;  %v315_v3 = vld [vmem:[%s1182_s2 + $0x10] sm:$0xff] (!%p262_p10)  ;;  %v314_v4 = vld [vmem:[%s1182_s2 + $0x8] sm:$0xff] (!%p262_p10) }
   0xf   : > { %265 = sbr.rel (%p262_p10) target bundleno = 732 (0x2dc), region = 48  ;;  %421 = vmatprep.mubr.f32.mxu0 (!%p262_p10), %v953_v0  ;;  %559 = vmatprep.mubr.f32.mxu1 (!%p262_p10), %v953_v0  ;;  %v316_v5 = vld [vmem:[%s1182_s2 + $0x18] sm:$0xff] (!%p262_p10)  ;;  %vm352_vm0 = vcmask (!%p262_p10), 1043456   ;;  %v309_v8 = vld [vmem:[%s1181_s1] sm:$0xff] (!%p262_p10)  ;;  %vm339_vm1 = vcmask (!%p262_p10), 31744   ;;  %v459_v10 = vld [vmem:[%s1184_s4 + $0x8] sm:$0xff] (!%p262_p10) }
  0x10   : > { %870 = vset.pattern.permute.xlu0 (!%p262_p10), %v954_v2  ;;  %871 = vset.pattern.permute.xlu1 (!%p262_p10), %v954_v2  ;;  %v458_v9 = vld [vmem:[%s1184_s4] sm:$0xff] (!%p262_p10)  ;;  %v310_v11 = vld [vmem:[%s1181_s1 + $0x8] sm:$0xff] (!%p262_p10)  ;;  %v460_v12 = vld [vmem:[%s1184_s4 + $0x10] sm:$0xff] (!%p262_p10)  ;;  %vm482_vm2 = vcmask (!%p262_p10), 261120   ;;  %s796_s19 = sshll.u32 (!%p262_p10), %s943_s27, 7 }
  0x11   : > { %319 = vperm.xlu0 (!%p262_p10), %870, %v313_v1   ;;  %329 = vperm.xlu1 (!%p262_p10), %871, %v315_v3   ;;  %v461_v13 = vld [vmem:[%s1184_s4 + $0x18] sm:$0xff] (!%p262_p10)  ;;  %v311_v14 = vld [vmem:[%s1181_s1 + $0x10] sm:$0xff] (!%p262_p10)  ;;  %v593_v15 = vld [vmem:[%s1186_s6] sm:$0xf] (!%p262_p10)  ;;  %s1133_s30 = scalar_lea.hbm (!%p262_p10), %s1187_s7, %s796_s19 }
  0x12   : > { %v312_v16 = vld [vmem:[%s1181_s1 + $0x18] sm:$0xff] (!%p262_p10)  ;;  %v454_v49 = vld [vmem:[%s1183_s3] sm:$0xff] (!%p262_p10)  ;;  %v455_v50 = vld [vmem:[%s1183_s3 + $0x8] sm:$0xff] (!%p262_p10) }
  0x13   : > { %v456_v51 = vld [vmem:[%s1183_s3 + $0x10] sm:$0xff] (!%p262_p10)  ;;  %v457_v52 = vld [vmem:[%s1183_s3 + $0x18] sm:$0xff] (!%p262_p10) }
  0x15   : > { %324 = vperm.xlu0 (!%p262_p10), %870, %v314_v4   ;;  %334 = vperm.xlu1 (!%p262_p10), %871, %v316_v5  }
  0x16   : > { %s299_s17 = scalar_select %p298_p11, %s943_s27, 1 }
  0x17   : > { %s955_s27 = smov [#allocation2]  }
  0x18   : > { %s795_s20 = sshll.u32 %s299_s17, 3  ;;  %s294_s17 = sand.u32 1, %s935_s25  }
  0x19   : > { %s305_s12 = scalar_lea.vmem %s1180_s0, %s795_s20  ;;  %464 = vperm.xlu0 %870, %v458_v9   ;;  %469 = vperm.xlu1 %871, %v459_v10   ;;  %s776_s18 = sshll.u32 %s294_s17, 3 }
  0x1a   : > { %v308_v6 = vld [vmem:[%s305_s12] sm:$0xff]  ;;  %s296_s21 = scalar_lea.vmem [#allocation2], %s776_s18  ;;  %s679_s8 = scalar_lea.sflag [#allocation3], %s294_s17 }
  0x1b   : > { %v338_v7 = vcombine.high %v308_v6, %v308_v6  ;;  %s695_s20 = sshll.u32 %s296_s21, 4  ;;  %s877_s12 = sshll.u32 %s955_s27, 4  ;;  %s1135_s20 = int_to_ptr.vmem [resolvable:$true] %s695_s20  ;;  %s878_s12 = int_to_ptr.vmem [resolvable:$false] %s877_s12 }
  0x1c   : > { %s873_s10 = scalar_lea.vmem %s1135_s20, 128  ;;  %s879_s15 = scalar_lea.vmem %s878_s12, 256 }
  0x1d   : > { %779 = vmatprep.subr.msk.mxu0 %vm352_vm0, %v338_v7  ;;  %474 = vperm.xlu0 %870, %v460_v12   ;;  %p874_p12 = scmp.ne.s32.totalorder %s1135_s20, %s873_s10  ;;  %p880_p1 = scmp.lt.s32.totalorder %s1135_s20, %s878_s12 }
  0x1e   : > { %780 = vmatpush1.msk.msra.mxu0 %vm352_vm0, %v308_v6  ;;  %479 = vperm.xlu1 %871, %v461_v13   ;;  %p881_p2 = scmp.lt.s32.totalorder %s879_s15, %s873_s10 }
  0x1f   : > { %781 = vmatmul.mubr.msk.f32.vlgmr.msra.gmra.mrb[0].mxu0 %vm339_vm1, %v309_v8  ;;  %p875_p13 = pnand %p874_p12, %p1036_p4 }
  0x20   : > { %427 = vmatprep.mubr.f32.mxu0 %v953_v0  ;;  %p882_p3 = por %p881_p2, %p880_p1 }
  0x21   : > { %596 = vperm.xlu0 %870, %v593_v15   ;;  %p876_p0 = pneg %p875_p13 }
  0x23   : > { %782 = vmatmul.mubr.msk.f32.gmra.mrb[2].mxu0 %vm339_vm1, %v310_v11  ;;  %p883_p5 = pnand %p882_p3, %p876_p0 }
  0x24   : > { %433 = vmatprep.mubr.f32.mxu0 %v953_v0 }
  0x27   : > { %783 = vmatmul.mubr.msk.f32.gmra.mrb[4].mxu0 %vm339_vm1, %v311_v14 }
  0x28   : > { %439 = vmatprep.mubr.f32.mxu0 %v953_v0 }
  0x2b   : > { %784 = vmatmul.mubr.msk.f32.gmra.mrb[6].mxu0 %vm339_vm1, %v312_v16 }
  0x2c   : > { %666 = vmatprep.mubr.f32.mxu0 %v953_v0 }
  0x90   : > { %v320_v17 = vpop.permute.xlu0 %319  ;;  %v330_v26 = vpop.permute.xlu1 %329 }
  0x94   : > { %v325_v21 = vpop.permute.xlu0 %324  ;;  %v335_v37 = vpop.permute.xlu1 %334 }
  0x98   : > { %v465_v55 = vpop.permute.xlu0 %464  ;;  %v470_v57 = vpop.permute.xlu1 %469 }
  0x9c   : > { %v475_v6 = vpop.permute.xlu0 %474 }
  0x9d   : > { %v480_v9 = vpop.permute.xlu1 %479 }
  0xf2   : > { %v423_v18 = vpop.f32.mrb[0].mxu0 }
  0xf3   : > { %v425_v19 = vpop.f32.mrb[1].mxu0  ;;  %v424_v20 = vadd.f32 %v423_v18, %v320_v17 }
  0xf4   : > { %v426_v22 = vadd.f32 %v425_v19, %v320_v17 }
  0xf5   : > { %v446_v28 = vmax.f32 %v424_v20, 0.0 }
  0xf6   : > { %v429_v23 = vpop.f32.mrb[2].mxu0  ;;  %v447_v30 = vmax.f32 %v426_v22, 0.0  ;;  %v597_v22 = vpop.permute.xlu0 %596 }
  0xf7   : > { %v430_v24 = vadd.f32 %v429_v23, %v325_v21  ;;  %v431_v25 = vpop.f32.mrb[3].mxu0 }
  0xf8   : > { %v432_v27 = vadd.f32 %v431_v25, %v325_v21  ;;  %v592_v21 = vld [vmem:[%s1185_s5] sm:$0xf] }
  0xf9   : > { %v448_v29 = vmax.f32 %v430_v24, 0.0 }
  0xfa   : > { %v449_v31 = vmax.f32 %v432_v27, 0.0  ;;  %v435_v32 = vpop.f32.mrb[4].mxu0 }
  0xfb   : > { %v437_v33 = vpop.f32.mrb[5].mxu0  ;;  %v799_v34 = vpack.c.bf16 %v448_v29, %v446_v28  ;;  %v436_v36 = vadd.f32 %v435_v32, %v330_v26 }
  0xfc   : > { %v797_v35 = vpack.c.bf16 %v449_v31, %v447_v30  ;;  %v438_v38 = vadd.f32 %v437_v33, %v330_v26 }
  0xfd   : > { %v450_v43 = vmax.f32 %v436_v36, 0.0 }
  0xfe   : > { %v441_v39 = vpop.f32.mrb[6].mxu0  ;;  %798 = vmatprep.subr.bf16.mxu1 %v797_v35  ;;  %v451_v45 = vmax.f32 %v438_v38, 0.0 }
  0xff   : > { %v442_v40 = vadd.f32 %v441_v39, %v335_v37  ;;  %v443_v41 = vpop.f32.mrb[7].mxu0  ;;  %800 = vmatpush1.bf16.msra.mxu1 %v799_v34 }
 0x100   : > { %v444_v42 = vadd.f32 %v443_v41, %v335_v37 }
 0x101   : > { %v452_v44 = vmax.f32 %v442_v40, 0.0 }
 0x102   : > { %v453_v46 = vmax.f32 %v444_v42, 0.0 }
 0x103   : > { %v803_v47 = vpack.c.bf16 %v452_v44, %v450_v43 }
 0x104   : > { %v801_v48 = vpack.c.bf16 %v453_v46, %v451_v45 }
 0x106   : > { %802 = vmatprep.subr.bf16.mxu1 %v801_v48 }
 0x107   : > { %804 = vmatpush1.bf16.msra.mxu1 %v803_v47 }
 0x10a   : > { %785 = vmatmul.mubr.msk.f32.vlgmr.msra.gmra.mrb[0].mxu1 %vm482_vm2, %v454_v49 }
 0x10b   : > { %565 = vmatprep.mubr.f32.mxu1 %v953_v0 }
 0x10e   : > { %786 = vmatmul.mubr.msk.f32.gmra.mrb[2].mxu1 %vm482_vm2, %v455_v50 }
 0x10f   : > { %571 = vmatprep.mubr.f32.mxu1 %v953_v0 }
 0x112   : > { %787 = vmatmul.mubr.msk.f32.gmra.mrb[4].mxu1 %vm482_vm2, %v456_v51 }
 0x113   : > { %577 = vmatprep.mubr.f32.mxu1 %v953_v0 }
 0x116   : > { %788 = vmatmul.mubr.msk.f32.gmra.mrb[6].mxu1 %vm482_vm2, %v457_v52 }
 0x1dd   : > { %v561_v53 = vpop.f32.mrb[0].mxu1 }
 0x1de   : > { %v563_v54 = vpop.f32.mrb[1].mxu1  ;;  %v562_v56 = vadd.f32 %v561_v53, %v465_v55 }
 0x1df   : > { %v564_v58 = vadd.f32 %v563_v54, %v465_v55 }
 0x1e0   : > { %v584_v63 = vmax.f32 %v562_v56, 0.0 }
 0x1e1   : > { %v567_v59 = vpop.f32.mrb[2].mxu1  ;;  %v585_v2 = vmax.f32 %v564_v58, 0.0 }
 0x1e2   : > { %v568_v60 = vadd.f32 %v567_v59, %v470_v57  ;;  %v569_v61 = vpop.f32.mrb[3].mxu1 }
 0x1e3   : > { %v570_v62 = vadd.f32 %v569_v61, %v470_v57 }
 0x1e4   : > { %v586_v1 = vmax.f32 %v568_v60, 0.0 }
 0x1e5   : > { %v587_v0 = vmax.f32 %v570_v62, 0.0  ;;  %v573_v3 = vpop.f32.mrb[4].mxu1 }
 0x1e6   : > { %v807_v4 = vpack.c.bf16 %v586_v1, %v584_v63  ;;  %v575_v5 = vpop.f32.mrb[5].mxu1  ;;  %v574_v8 = vadd.f32 %v573_v3, %v475_v6 }
 0x1e7   : > { %v805_v7 = vpack.c.bf16 %v587_v0, %v585_v2  ;;  %v576_v10 = vadd.f32 %v575_v5, %v475_v6 }
 0x1e8   : > { %v588_v15 = vmax.f32 %v574_v8, 0.0 }
 0x1e9   : > { %v579_v11 = vpop.f32.mrb[6].mxu1  ;;  %806 = vmatprep.subr.bf16.mxu0 %v805_v7  ;;  %v589_v17 = vmax.f32 %v576_v10, 0.0 }
 0x1ea   : > { %v580_v12 = vadd.f32 %v579_v11, %v480_v9  ;;  %v581_v13 = vpop.f32.mrb[7].mxu1  ;;  %808 = vmatpush1.bf16.msra.mxu0 %v807_v4 }
 0x1eb   : > { %v582_v14 = vadd.f32 %v581_v13, %v480_v9 }
 0x1ec   : > { %v590_v16 = vmax.f32 %v580_v12, 0.0 }
 0x1ed   : > { %v591_v18 = vmax.f32 %v582_v14, 0.0 }
 0x1ee   : > { %v811_v19 = vpack.c.bf16 %v590_v16, %v588_v15 }
 0x1ef   : > { %v809_v20 = vpack.c.bf16 %v591_v18, %v589_v17 }
 0x1f1   : > { %810 = vmatprep.subr.bf16.mxu0 %v809_v20 }
 0x1f2   : > { %812 = vmatpush1.bf16.msra.mxu0 %v811_v19 }
 0x1f5   : > { %789 = vmatmul.mubr.msk.f32.vlgmr.msra.gmra.mrb[8].mxu0 %vm482_vm2, %v592_v21 }
 0x2c8   : > { %v668_v23 = vpop.f32.mrb[8].mxu0 }
 0x2c9   : > { %v669_v24 = vadd.f32 %v668_v23, %v597_v22  ;;  %v670_v25 = vpop.f32.mrb[9].mxu0 }
 0x2ca   : > { %v671_v26 = vadd.f32 %v670_v25, %v597_v22 }
 0x2cc   : > { %v675_v27 = vcombine.low %v669_v24, %v671_v26 }
 0x2ce   : > { %677 = vst [vmem:[%s296_s21] sm:$0xff] %v675_v27 }
 0x2cf   : > { %886 = shalt.err (!%p883_p5)
}
 0x2d0   : > { %s887_s16 = scalar_lea.hbm %s1133_s30, 128  ;;  %s891_s19 = scalar_lea.hbm %s1187_s7, 256 }
 0x2d1   : > { %p888_p6 = scmp.ne.s32.totalorder %s1133_s30, %s887_s16  ;;  %p892_p10 = scmp.lt.u32.totalorder %s1133_s30, %s1187_s7 }
 0x2d2   : > { %p893_p11 = scmp.lt.u32.totalorder %s891_s19, %s887_s16  ;;  %p895_p13 = scmp.lt.u32.totalorder %s887_s16, %s1133_s30 }
 0x2d3   : > { %p889_p7 = pnand %p888_p6, %p1036_p4 }
 0x2d4   : > { %p894_p12 = por %p893_p11, %p892_p10 }
 0x2d5   : > { %p890_p9 = pneg %p889_p7 }
 0x2d6   : > { %p896_p0 = por %p895_p13, %p894_p12 }
 0x2d8   : > { %p897_p1 = pnand %p896_p0, %p890_p9 }
 0x2da   : > { %900 = shalt.err (!%p897_p1)
}
 0x2db   : > { %813 = dma.vmem_to_hbm [thread:$0]  (%p1036_p4), %s1135_s20, 128, %s1133_s30, %s679_s8  }
 0x2dc PF: > { %p819_p2 = scmp.ge.s32.totalorder %s951_s29, 2  ;;  %s707_s23 = sand.u32 1, %s931_s24  }
 0x2dd   : > { %s708_s10 = scalar_lea.sflag [#allocation3], %s707_s23 }
 0x2de   : > { %p816_p3 = pnand %p819_p2, %p1043_p8 }
 0x2e0   : > { %926 = dma.done.wait (!%p816_p3), %s708_s10, 128  }
 0x2e1   : > { %928 = vsyncadd (!%p816_p3), %s708_s10, 4294967168  ;;  %s20_s29 = sadd.s32 1, %s951_s29   ;;  %s1190_s24 = smov %s935_s25 }
 0x2e2   : > { %p17_p5 = scmp.ge.s32.totalorder %s20_s29, 4   ;;  %s1191_s25 = smov %s939_s26 }
 0x2e3   : > { %s1192_s26 = smov %s1049_s14  ;;  %s1193_s27 = smov %s947_s28 }
 0x2e4   : > { %s1194_s28 = smov %s1196_s9  ;;  %19 = sbr.rel (!%p17_p5) target bundleno = 4 (0x4), region = 83 }
 0x2eb   :  { %713 = vsyncpa [#allocation3], 1 }
 0x2ec   :  { %715 = vsyncpa [#allocation3 + $0x1], 1 }

</bundles_post_ra>
